<compile_context>
chip_gen: v6e
topology: v6e:2x2x1
jax: 0.10.0
libtpu: 0.0.40
codegen_flags: <defaults>
</compile_context>

<pallas_src>
import functools

import jax
import jax.numpy as jnp
from jax.experimental import pallas as pl
from jax.experimental.pallas import tpu as pltpu

BN_EPS = 0.001


# --------------------------------------------------------------------------
# Kernel
# --------------------------------------------------------------------------
def _make_kernel(n_mlp_layers: int, g: int):
    """Kernel for one batch tile.

    refs layout:
      inputs : z_tile, library_tile, [W_fold, b_fold] * n_mlp, W_heads, b_heads
      outputs: normalized, disperation, imputation, dropoutrate   (each (TB, G))
    """

    def kernel(*refs):
        idx = 0
        z_ref = refs[idx]; idx += 1
        lib_ref = refs[idx]; idx += 1

        h = z_ref[...]
        for _ in range(n_mlp_layers):
            w = refs[idx][...]
            b = refs[idx + 1][...]
            idx += 2
            # Linear with BatchNorm (eval) already folded into (w, b), then ReLU.
            h = jnp.dot(h, w, preferred_element_type=jnp.float32) + b
            h = jnp.maximum(h, 0.0)
            # Dropout: identity at inference time.
            # TODO(synk): training-mode dropout / batch statistics not modeled.

        w_heads = refs[idx][...]   # (hidden, 3*G)  = [Ws | Wr | Wd]
        b_heads = refs[idx + 1][...]
        idx += 2
        norm_ref, disp_ref, imp_ref, drop_ref = refs[idx:idx + 4]

        # Single fused head matmul (one MXU pass instead of three).
        # TODO(synk): optionally cast h / weights to bf16 for higher MXU
        # throughput on v6e/v7x; kept f32 here for tight numerics at toy sizes.
        heads = jnp.dot(h, w_heads, preferred_element_type=jnp.float32) + b_heads
        scale = heads[:, 0 * g:1 * g]
        r = heads[:, 1 * g:2 * g]
        d = heads[:, 2 * g:3 * g]

        # decoder_scale -> softmax over the feature axis (dim=1)
        scale = scale - jnp.max(scale, axis=1, keepdims=True)
        e = jnp.exp(scale)
        inv_sum = pl.reciprocal(jnp.sum(e, axis=1, keepdims=True), approx=True)
        normalized = e * inv_sum
        norm_ref[...] = normalized

        # imputation = exp(library) * normalized   (library broadcasts (TB, 1))
        imp_ref[...] = jnp.exp(lib_ref[...]) * normalized

        # disperation = exp(decoder_r(latent))
        disp_ref[...] = jnp.exp(r)

        # dropoutrate = dropout(latent)   (plain Linear, no activation)
        drop_ref[...] = d

    return kernel


# --------------------------------------------------------------------------
# Parameter prep (PyTorch-shaped params  ->  folded kernel params)
# --------------------------------------------------------------------------
def init_params(key, layer, hidden, input_size):
    """Deterministic parameter init mirroring the PyTorch module shapes."""

    def linear(k, n_in, n_out):
        k1, k2 = jax.random.split(k)
        bound = 1.0 / (n_in ** 0.5)
        w = jax.random.uniform(k1, (n_in, n_out), jnp.float32, -bound, bound)
        b = jax.random.uniform(k2, (1, n_out), jnp.float32, -bound, bound)
        return w, b

    keys = jax.random.split(key, len(layer) + 3)
    mlp = []
    if len(layer) > 1:
        for i, (n_in, n_out) in enumerate(zip(layer[:-1], layer[1:])):
            w, b = linear(keys[i], n_in, n_out)
            gamma = jnp.ones((1, n_out), jnp.float32)
            beta = jnp.zeros((1, n_out), jnp.float32)
            rmean = jnp.zeros((1, n_out), jnp.float32)
            rvar = jnp.ones((1, n_out), jnp.float32)
            mlp.append((w, b, gamma, beta, rmean, rvar))
    scale = linear(keys[-3], hidden, input_size)
    r = linear(keys[-2], hidden, input_size)
    drop = linear(keys[-1], hidden, input_size)
    return dict(mlp=mlp, scale=scale, r=r, dropout=drop)


def fold_params(params):
    """Fold eval-mode BatchNorm into the Linear weights; fuse the three heads."""
    folded_mlp = []
    for (w, b, gamma, beta, rmean, rvar) in params["mlp"]:
        s = gamma * jax.lax.rsqrt(rvar + BN_EPS)          # (1, n_out)
        w_f = w * s                                        # (n_in, n_out)
        b_f = (b - rmean) * s + beta                       # (1, n_out)
        folded_mlp.append((w_f, b_f))
    ws, bs = params["scale"]
    wr, br = params["r"]
    wd, bd = params["dropout"]
    w_heads = jnp.concatenate([ws, wr, wd], axis=1)        # (hidden, 3*G)
    b_heads = jnp.concatenate([bs, br, bd], axis=1)        # (1, 3*G)
    return folded_mlp, w_heads, b_heads


# --------------------------------------------------------------------------
# pallas_call wrapper
# --------------------------------------------------------------------------
@functools.partial(jax.jit, static_argnames=("n_mlp", "g", "tb"))
def _run(z, library, flat_params, n_mlp, g, tb):
    batch, d_in = z.shape
    grid = (pl.cdiv(batch, tb),)

    # Activations / outputs: tiled along batch, full feature width (lane-dense).
    in_specs = [
        pl.BlockSpec((tb, d_in), lambda i: (i, 0)),
        pl.BlockSpec((tb, 1), lambda i: (i, 0)),
    ]
    # Weights / biases: whole array, resident across all grid steps.
    for p in flat_params:
        in_specs.append(pl.BlockSpec(p.shape, lambda i: (0, 0)))

    out_specs = tuple(pl.BlockSpec((tb, g), lambda i: (i, 0)) for _ in range(4))
    out_shape = tuple(
        jax.ShapeDtypeStruct((batch, g), jnp.float32) for _ in range(4)
    )

    return pl.pallas_call(
        _make_kernel(n_mlp, g),
        grid=grid,
        in_specs=in_specs,
        out_specs=out_specs,
        out_shape=out_shape,
        compiler_params=pltpu.CompilerParams(
            dimension_semantics=("parallel",),       # megacore: split batch tiles
            vmem_limit_bytes=48 * 1024 * 1024,        # headroom under v7x 64 MiB
        ),
    )(z, library, *flat_params)


def decoder_zinb_forward(z, library, params, batch_tile=None):
    folded_mlp, w_heads, b_heads = fold_params(params)
    flat = []
    for (w, b) in folded_mlp:
        flat.extend((w, b))
    flat.extend((w_heads, b_heads))

    g = params["scale"][0].shape[1]
    batch = z.shape[0]
    tb = batch_tile if batch_tile is not None else min(batch, 128)

    outs = _run(z, library, tuple(flat), n_mlp=len(folded_mlp), g=g, tb=tb)
    return dict(
        normalized=outs[0],
        disperation=outs[1],
        imputation=outs[2],
        dropoutrate=outs[3],
    )


# --------------------------------------------------------------------------
# Pure-JAX reference (mirrors the PyTorch forward, eval mode)
# --------------------------------------------------------------------------
def reference_forward(z, library, params):
    h = z
    for (w, b, gamma, beta, rmean, rvar) in params["mlp"]:
        h = h @ w + b
        h = (h - rmean) / jnp.sqrt(rvar + BN_EPS) * gamma + beta
        h = jnp.maximum(h, 0.0)
    ws, bs = params["scale"]
    wr, br = params["r"]
    wd, bd = params["dropout"]
    normalized = jax.nn.softmax(h @ ws + bs, axis=1)
    return dict(
        normalized=normalized,
        disperation=jnp.exp(h @ wr + br),
        imputation=jnp.exp(library) * normalized,
        dropoutrate=h @ wd + bd,
    )


if __name__ == "__main__":
    # Small shapes consistent with the module:
    #   layer = [latent_dim, hidden], hidden = layer[-1], input_size = gene dim
    batch, latent_dim, hidden, input_size = 4, 8, 32, 16
    layer = [latent_dim, hidden]

    key = jax.random.PRNGKey(0)
    kz, klib, kp = jax.random.split(key, 3)
    z = jax.random.normal(kz, (batch, latent_dim), jnp.float32)
    library = jax.random.normal(klib, (batch, 1), jnp.float32)
    params = init_params(kp, layer, hidden, input_size)

    out = decoder_zinb_forward(z, library, params)
    out = jax.tree_util.tree_map(jax.block_until_ready, out)

    ref = reference_forward(z, library, params)
    # normalized / imputation use pl.reciprocal(approx=True) -> slightly looser tol.
    tols = {
        "normalized": (1e-5, 2e-3),
        "imputation": (1e-5, 2e-3),
        "disperation": (1e-5, 1e-4),
        "dropoutrate": (1e-5, 1e-4),
    }
    for name, (atol, rtol) in tols.items():
        assert out[name].shape == (batch, input_size), name
        assert jnp.allclose(out[name], ref[name], atol=atol, rtol=rtol), name

    print("KERNEL_OK")
</pallas_src>

<mosaic_0001>
module attributes {stable_mosaic.version = 11 : i64} {
  func.func @kernel(%arg0: i32, %arg1: memref<4x8xf32, #tpu.memory_space<vmem>>, %arg2: memref<4x1xf32, #tpu.memory_space<vmem>>, %arg3: memref<8x32xf32, #tpu.memory_space<vmem>>, %arg4: memref<1x32xf32, #tpu.memory_space<vmem>>, %arg5: memref<32x48xf32, #tpu.memory_space<vmem>>, %arg6: memref<1x48xf32, #tpu.memory_space<vmem>>, %arg7: memref<4x16xf32, #tpu.memory_space<vmem>>, %arg8: memref<4x16xf32, #tpu.memory_space<vmem>>, %arg9: memref<4x16xf32, #tpu.memory_space<vmem>>, %arg10: memref<4x16xf32, #tpu.memory_space<vmem>>) attributes {dimension_semantics = [#tpu.dimension_semantics<parallel>], iteration_bounds = array<i64: 1>, scalar_prefetch = 0 : i64, scratch_operands = 0 : i64, tpu.core_type = #tpu.core_type<tc>, window_params = [{transform_indices = @transform_0, window_bounds = array<i64: 4, 8>}, {transform_indices = @transform_1, window_bounds = array<i64: 4, 1>}, {pipeline_mode = #tpu.pipeline_mode<synchronous>, transform_indices = @transform_2, window_bounds = array<i64: 8, 32>}, {pipeline_mode = #tpu.pipeline_mode<synchronous>, transform_indices = @transform_3, window_bounds = array<i64: 1, 32>}, {pipeline_mode = #tpu.pipeline_mode<synchronous>, transform_indices = @transform_4, window_bounds = array<i64: 32, 48>}, {pipeline_mode = #tpu.pipeline_mode<synchronous>, transform_indices = @transform_5, window_bounds = array<i64: 1, 48>}, {transform_indices = @transform_6, window_bounds = array<i64: 4, 16>}, {transform_indices = @transform_7, window_bounds = array<i64: 4, 16>}, {transform_indices = @transform_8, window_bounds = array<i64: 4, 16>}, {transform_indices = @transform_9, window_bounds = array<i64: 4, 16>}]} {
    %c0 = arith.constant 0 : index
    %c0_0 = arith.constant 0 : index
    %0 = vector.load %arg1[%c0, %c0_0] : memref<4x8xf32, #tpu.memory_space<vmem>>, vector<4x8xf32>
    %c0_1 = arith.constant 0 : index
    %c0_2 = arith.constant 0 : index
    %1 = vector.load %arg3[%c0_1, %c0_2] : memref<8x32xf32, #tpu.memory_space<vmem>>, vector<8x32xf32>
    %c0_3 = arith.constant 0 : index
    %c0_4 = arith.constant 0 : index
    %2 = vector.load %arg4[%c0_3, %c0_4] : memref<1x32xf32, #tpu.memory_space<vmem>>, vector<1x32xf32>
    %cst = arith.constant dense<0.000000e+00> : vector<4x32xf32>
    %3 = tpu.matmul %0, %1, %cst {dimension_numbers = #tpu.dot_dimension_numbers<[1], [0], [0], [1], [0, 0, 1, 1], [], []>} : vector<4x8xf32>, vector<8x32xf32>, vector<4x32xf32> -> vector<4x32xf32>
    %4 = vector.broadcast %2 : vector<1x32xf32> to vector<4x32xf32>
    %5 = arith.addf %3, %4 : vector<4x32xf32>
    %cst_5 = arith.constant 0.000000e+00 : f32
    %6 = vector.broadcast %cst_5 : f32 to vector<4x32xf32>
    %7 = arith.maximumf %5, %6 : vector<4x32xf32>
    %c0_6 = arith.constant 0 : index
    %c0_7 = arith.constant 0 : index
    %8 = vector.load %arg5[%c0_6, %c0_7] : memref<32x48xf32, #tpu.memory_space<vmem>>, vector<32x48xf32>
    %c0_8 = arith.constant 0 : index
    %c0_9 = arith.constant 0 : index
    %9 = vector.load %arg6[%c0_8, %c0_9] : memref<1x48xf32, #tpu.memory_space<vmem>>, vector<1x48xf32>
    %cst_10 = arith.constant dense<0.000000e+00> : vector<4x48xf32>
    %10 = tpu.matmul %7, %8, %cst_10 {dimension_numbers = #tpu.dot_dimension_numbers<[1], [0], [0], [1], [0, 0, 1, 1], [], []>} : vector<4x32xf32>, vector<32x48xf32>, vector<4x48xf32> -> vector<4x48xf32>
    %11 = vector.broadcast %9 : vector<1x48xf32> to vector<4x48xf32>
    %12 = arith.addf %10, %11 : vector<4x48xf32>
    %13 = vector.extract_strided_slice %12 {offsets = [0, 0], sizes = [4, 16], strides = [1, 1]} : vector<4x48xf32> to vector<4x16xf32>
    %14 = vector.extract_strided_slice %12 {offsets = [0, 16], sizes = [4, 16], strides = [1, 1]} : vector<4x48xf32> to vector<4x16xf32>
    %15 = vector.extract_strided_slice %12 {offsets = [0, 32], sizes = [4, 16], strides = [1, 1]} : vector<4x48xf32> to vector<4x16xf32>
    %cst_11 = arith.constant dense<0xFF800000> : vector<4xf32>
    %16 = vector.multi_reduction <maximumf>, %13, %cst_11 [1] : vector<4x16xf32> to vector<4xf32>
    %17 = vector.shape_cast %16 : vector<4xf32> to vector<4x1xf32>
    %18 = vector.broadcast %17 : vector<4x1xf32> to vector<4x16xf32>
    %19 = arith.subf %13, %18 : vector<4x16xf32>
    %20 = math.exp %19 : vector<4x16xf32>
    %cst_12 = arith.constant dense<0.000000e+00> : vector<4xf32>
    %21 = vector.multi_reduction <add>, %20, %cst_12 [1] : vector<4x16xf32> to vector<4xf32>
    %22 = vector.shape_cast %21 : vector<4xf32> to vector<4x1xf32>
    %23 = tpu.reciprocal %22 {approx = true} : vector<4x1xf32> -> vector<4x1xf32>
    %24 = vector.broadcast %23 : vector<4x1xf32> to vector<4x16xf32>
    %25 = arith.mulf %20, %24 : vector<4x16xf32>
    %c0_13 = arith.constant 0 : index
    %c0_14 = arith.constant 0 : index
    %26 = vector.load %arg7[%c0_13, %c0_14] : memref<4x16xf32, #tpu.memory_space<vmem>>, vector<4x16xf32>
    tpu.vector_store %arg7[%c0_13, %c0_14], %25 {strides = array<i32>} : memref<4x16xf32, #tpu.memory_space<vmem>>, vector<4x16xf32>,
    %c0_15 = arith.constant 0 : index
    %c0_16 = arith.constant 0 : index
    %27 = vector.load %arg2[%c0_15, %c0_16] : memref<4x1xf32, #tpu.memory_space<vmem>>, vector<4x1xf32>
    %28 = math.exp %27 : vector<4x1xf32>
    %29 = vector.broadcast %28 : vector<4x1xf32> to vector<4x16xf32>
    %30 = arith.mulf %29, %25 : vector<4x16xf32>
    %c0_17 = arith.constant 0 : index
    %c0_18 = arith.constant 0 : index
    %31 = vector.load %arg9[%c0_17, %c0_18] : memref<4x16xf32, #tpu.memory_space<vmem>>, vector<4x16xf32>
    tpu.vector_store %arg9[%c0_17, %c0_18], %30 {strides = array<i32>} : memref<4x16xf32, #tpu.memory_space<vmem>>, vector<4x16xf32>,
    %32 = math.exp %14 : vector<4x16xf32>
    %c0_19 = arith.constant 0 : index
    %c0_20 = arith.constant 0 : index
    %33 = vector.load %arg8[%c0_19, %c0_20] : memref<4x16xf32, #tpu.memory_space<vmem>>, vector<4x16xf32>
    tpu.vector_store %arg8[%c0_19, %c0_20], %32 {strides = array<i32>} : memref<4x16xf32, #tpu.memory_space<vmem>>, vector<4x16xf32>,
    %c0_21 = arith.constant 0 : index
    %c0_22 = arith.constant 0 : index
    %34 = vector.load %arg10[%c0_21, %c0_22] : memref<4x16xf32, #tpu.memory_space<vmem>>, vector<4x16xf32>
    tpu.vector_store %arg10[%c0_21, %c0_22], %15 {strides = array<i32>} : memref<4x16xf32, #tpu.memory_space<vmem>>, vector<4x16xf32>,
    return
  }
  func.func @transform_0(%arg0: i32) -> (i32, i32) {
    %c0_i32 = arith.constant 0 : i32
    %c0_i32_0 = arith.constant 0 : i32
    return %arg0, %c0_i32 : i32, i32
  }
  func.func @transform_1(%arg0: i32) -> (i32, i32) {
    %c0_i32 = arith.constant 0 : i32
    %c0_i32_0 = arith.constant 0 : i32
    return %arg0, %c0_i32 : i32, i32
  }
  func.func @transform_2(%arg0: i32) -> (i32, i32) {
    %c0_i32 = arith.constant 0 : i32
    %c0_i32_0 = arith.constant 0 : i32
    %c0_i32_1 = arith.constant 0 : i32
    return %c0_i32, %c0_i32_0 : i32, i32
  }
  func.func @transform_3(%arg0: i32) -> (i32, i32) {
    %c0_i32 = arith.constant 0 : i32
    %c0_i32_0 = arith.constant 0 : i32
    %c0_i32_1 = arith.constant 0 : i32
    return %c0_i32, %c0_i32_0 : i32, i32
  }
  func.func @transform_4(%arg0: i32) -> (i32, i32) {
    %c0_i32 = arith.constant 0 : i32
    %c0_i32_0 = arith.constant 0 : i32
    %c0_i32_1 = arith.constant 0 : i32
    return %c0_i32, %c0_i32_0 : i32, i32
  }
  func.func @transform_5(%arg0: i32) -> (i32, i32) {
    %c0_i32 = arith.constant 0 : i32
    %c0_i32_0 = arith.constant 0 : i32
    %c0_i32_1 = arith.constant 0 : i32
    return %c0_i32, %c0_i32_0 : i32, i32
  }
  func.func @transform_6(%arg0: i32) -> (i32, i32) {
    %c0_i32 = arith.constant 0 : i32
    %c0_i32_0 = arith.constant 0 : i32
    return %arg0, %c0_i32 : i32, i32
  }
  func.func @transform_7(%arg0: i32) -> (i32, i32) {
    %c0_i32 = arith.constant 0 : i32
    %c0_i32_0 = arith.constant 0 : i32
    return %arg0, %c0_i32 : i32, i32
  }
  func.func @transform_8(%arg0: i32) -> (i32, i32) {
    %c0_i32 = arith.constant 0 : i32
    %c0_i32_0 = arith.constant 0 : i32
    return %arg0, %c0_i32 : i32, i32
  }
  func.func @transform_9(%arg0: i32) -> (i32, i32) {
    %c0_i32 = arith.constant 0 : i32
    %c0_i32_0 = arith.constant 0 : i32
    return %arg0, %c0_i32 : i32, i32
  }
}

</mosaic_0001>

<bundles_post_ra>
// kernel: _run.1
= control target key start
LH: loop header
LB: loop body
LE: loop exit
PB: predicated region body
PF: predicated region fallthrough
CT: control target
= control target key end

     0   :  { %15 = vsyncpa [#allocation3], 0  ;;  %s596_s0 = inlined_call_operand.hbm [shape: f32[4,8], index: 0, kind: input, shape index: {}]   ;;  %s597_s1 = inlined_call_operand.vmem [shape: f32[4,1], index: 1, kind: input, shape index: {}]   ;;  %s598_s2 = inlined_call_operand.vmem [shape: f32[8,32], index: 2, kind: input, shape index: {}]   ;;  %s599_s3 = inlined_call_operand.vmem [shape: f32[1,32], index: 3, kind: input, shape index: {}]   ;;  %s600_s4 = inlined_call_operand.hbm [shape: f32[32,48], index: 4, kind: input, shape index: {}]   ;;  %s601_s5 = inlined_call_operand.vmem [shape: f32[1,48], index: 5, kind: input, shape index: {}]   ;;  %s602_s6 = inlined_call_operand.hbm [shape: f32[4,16], index: 6, kind: output, shape index: {0}]   ;;  %s603_s7 = inlined_call_operand.hbm [shape: f32[4,16], index: 7, kind: output, shape index: {1}]   ;;  %s604_s8 = inlined_call_operand.hbm [shape: f32[4,16], index: 8, kind: output, shape index: {2}]   ;;  %s605_s9 = inlined_call_operand.hbm [shape: f32[4,16], index: 9, kind: output, shape index: {3}]  }
   0x1   :  { %16 = vsyncpa [#allocation6], 0 }
   0x2   :  { %17 = vsyncpa [#allocation4], 0 }
   0x3   :  { %18 = vsyncpa [#allocation9], 0 }
   0x4   :  { %19 = vsyncpa [#allocation12], 0  ;;  %s497_s30 = smov [#allocation2]   ;;  %s498_s11 = smov [#allocation5]  }
   0x5   :  { %s26_s10 = sshll.u32 %s497_s30, 4  ;;  %s41_s12 = sshll.u32 %s498_s11, 4  ;;  %s27_s10 = int_to_ptr.vmem [resolvable:$true] %s26_s10  ;;  %s42_s12 = int_to_ptr.vmem [resolvable:$true] %s41_s12 }
   0x6   :  { %s375_s13 = scalar_lea.vmem %s27_s10, 64  ;;  %p380_p1 = scmp.lt.s32.totalorder %s27_s10, %s27_s10 }
   0x7   :  { %p376_p0 = scmp.ne.s32.totalorder %s27_s10, %s375_s13  ;;  %p381_p2 = scmp.lt.s32.totalorder %s375_s13, %s375_s13 }
   0x9   :  { %p382_p3 = por %p381_p2, %p380_p1 }
   0xb   :  { %p383_p4 = pnand %p382_p3, %p376_p0 }
   0xd   :  { %386 = shalt.err (!%p383_p4)
}
   0xe   :  { %29 = dma.hbm_to_vmem [thread:$0]  %s596_s0, 64, %s27_s10, [#allocation3]  }
   0xf   :  { %s395_s16 = scalar_lea.vmem %s42_s12, 512  ;;  %p400_p6 = scmp.lt.s32.totalorder %s42_s12, %s42_s12 }
  0x10   :  { %p396_p5 = scmp.ne.s32.totalorder %s42_s12, %s395_s16  ;;  %p401_p7 = scmp.lt.s32.totalorder %s395_s16, %s395_s16 }
  0x12   :  { %p402_p8 = por %p401_p7, %p400_p6 }
  0x14   :  { %p403_p9 = pnand %p402_p8, %p396_p5 }
  0x16   :  { %406 = shalt.err (!%p403_p9)
}
  0x17   :  { %s499_s17 = smov 128   ;;  %s500_s18 = smov 8  }
  0x18   :  { %47 = dma.hbm_to_vmem [thread:$0]  %s600_s4, 512, %s42_s12, [#allocation6], %s499_s17, %s499_s17, %s500_s18  }
  0x19   :  { %487 = dma.done.wait [#allocation3], 64  }
  0x1a   :  { %488 = vsyncadd [#allocation3], 4294967232 }
  0x1b   :  { %489 = dma.done.wait [#allocation6], 512  }
  0x1c   :  { %490 = vsyncadd [#allocation6], 4294966784  ;;  %v501_v0 = vmov 0.0   ;;  %vm502_vm0 = vmmov 0   ;;  %vm65_vm1 = vcmask 64512   ;;  %v57_v1 = vld [vmem:[%s598_s2] sm:$0xff] }
  0x1d   :  { %328 = vmatprep.subr.mxu0 %v501_v0  ;;  %330 = vmatprep.mubr.msk.f32.mxu0 %vm502_vm0, %v501_v0  ;;  %v56_v2 = vld [vmem:[#allocation2] sm:$0xf]  ;;  %v142_v4 = vld [vmem:[#allocation5 + $0x10] sm:$0xff]  ;;  %v141_v5 = vld [vmem:[#allocation5 + $0x8] sm:$0xff]  ;;  %vm151_vm2 = vcmask 261120   ;;  %v503_v15 = vmov 0  }
  0x1e   :  { %333 = vmatprep.subr.mxu1 %v501_v0  ;;  %341 = vmatprep.mubr.msk.f32.mxu1 %vm502_vm0, %v501_v0  ;;  %v143_v3 = vld [vmem:[#allocation5 + $0x18] sm:$0xff]  ;;  %v140_v6 = vld [vmem:[#allocation5] sm:$0xff]  ;;  %vm225_vm3 = vcmask 125952  }
  0x1f   :  { %329 = vmatpush3.msra.mxu0 %v57_v1  ;;  %334 = vmatpush3.msra.mxu1 %v143_v3  ;;  %v317_v7 = vld [vmem:[%s599_s3] ss:$0 sm:$0xff]  ;;  %s505_s3 = smov [#allocation8]  }
  0x20   :  { %331 = vmatmul.mubr.msk.f32.vlgmr.msra.gmra.mxu0 %vm65_vm1, %v56_v2  ;;  %335 = vmatprep.subr.mxu1 %v501_v0  ;;  %v238_v12 = vld [vmem:[%s597_s1] sm:$0xf]  ;;  %s504_s1 = smov 112  }
  0x21   :  { %336 = vmatpush3.msra.mxu1 %v142_v4  ;;  %v239_v13 = vmul.f32 1.442695, %v238_v12  ;;  %357 = vset.pattern.permute.xlu1 %v503_v15  ;;  %v319_v16 = vld [vmem:[%s601_s5] ss:$0 sm:$0xff]  ;;  %s276_s5 = sshll.u32 %s505_s3, 4  ;;  %s277_s5 = int_to_ptr.vmem [resolvable:$true] %s276_s5 }
  0x22   :  { %337 = vmatprep.subr.mxu1 %v501_v0  ;;  %358 = vset.pattern.permute.xlu0 %v503_v15  ;;  %s407_s26 = scalar_lea.vmem %s277_s5, 64  ;;  %p412_p11 = scmp.lt.s32.totalorder %s277_s5, %s277_s5 }
  0x23   :  { %338 = vmatpush3.msra.mxu1 %v141_v5  ;;  %359 = vpow2.f32 %v239_v13  ;;  %p408_p10 = scmp.ne.s32.totalorder %s277_s5, %s407_s26  ;;  %p413_p12 = scmp.lt.s32.totalorder %s407_s26, %s407_s26 }
  0x24   :  { %339 = vmatprep.subr.mxu1 %v501_v0 }
  0x25   :  { %340 = vmatpush3.msra.mxu1 %v140_v6  ;;  %p414_p13 = por %p413_p12, %p412_p11 }
  0x27   :  { %p415_p0 = pnand %p414_p13, %p408_p10 }
  0x30   :  { %v360_v14 = vpop.eup %359 }
  0x31   :  { %243 = vperm.xlu1 %357, %v360_v14  }
  0xac   :  { %v244_v23 = vpop.permute.xlu1 %243 }
  0xe0   :  { %v135_v8 = vpop.f32.mrf.mxu0 }
  0xe1   :  { %v136_v9 = vadd.f32 %v317_v7, %v135_v8 }
  0xe2   :  { %v332_v10 = vpop.f32.mrf.mxu0 }
  0xe3   :  { %v139_v11 = vmax.f32 %v136_v9, 0.0 }
  0xe5   :  { %342 = vmatmul.mubr.msk.f32.vlgmr.msra.gmra.mxu1 %vm151_vm2, %v139_v11 }
 0x1a5   :  { %v221_v17 = vpop.f32.mrf.mxu1 }
 0x1a6   :  { %v222_v18 = vadd.f32 %v319_v16, %v221_v17 }
 0x1a7   :  { %v343_v19 = vpop.f32.mrf.mxu1 }
 0x1a8   :  { %v248_v20 = vmul.f32 1.442695, %v222_v18  ;;  %v226_v21 = vsel %vm225_vm3, %v222_v18, -inf }
 0x1a9   :  { %227 = vmax.xlane.f32.xlu0 %v226_v21 }
 0x1aa   :  { %361 = vpow2.f32 %v248_v20 }
 0x1b7   :  { %v362_v22 = vpop.eup %361 }
 0x1b8   :  { %251 = vrot.lane.b32.xlu1 %v362_v22, %s504_s1 }
 0x22a   :  { %v252_v24 = vpop.permute.xlu1 %251 }
 0x22b   :  { %254 = vst.msk [vmem:[#allocation8] sm:$0xf] %vm225_vm3, %v252_v24 }
 0x232   :  { %v228_v25 = vpop.xlane.xlu0 %227 }
 0x233   :  { %v229_v26 = vsub.f32 %v222_v18, %v228_v25 }
 0x235   :  { %v230_v27 = vmul.f32 1.442695, %v229_v26 }
 0x237   :  { %363 = vpow2.f32 %v230_v27 }
 0x244   :  { %v364_v28 = vpop.eup %363 }
 0x245   :  { %v232_v29 = vsel %vm225_vm3, %v364_v28, 0.0 }
 0x246   :  { %233 = vadd.xlane.f32.xlu0 %v232_v29 }
 0x247   :  { %418 = shalt.err (!%p415_p0)
}
 0x248   :  { %279 = dma.vmem_to_hbm [thread:$0]  %s277_s5, 64, %s603_s7, [#allocation9]  }
 0x249   :  { %s506_s29 = smov 96   ;;  %s507_s30 = smov [#allocation11]  }
 0x24a   :  { %s296_s10 = sshll.u32 %s507_s30, 4  ;;  %s297_s10 = int_to_ptr.vmem [resolvable:$true] %s296_s10 }
 0x24b   :  { %s427_s11 = scalar_lea.vmem %s297_s10, 64  ;;  %p432_p2 = scmp.lt.s32.totalorder %s297_s10, %s297_s10 }
 0x24c   :  { %p428_p1 = scmp.ne.s32.totalorder %s297_s10, %s427_s11  ;;  %p433_p3 = scmp.lt.s32.totalorder %s427_s11, %s427_s11 }
 0x24e   :  { %p434_p4 = por %p433_p3, %p432_p2 }
 0x250   :  { %p435_p5 = pnand %p434_p4, %p428_p1 }
 0x25c   :  { %256 = vrot.lane.b32.xlu0 %v222_v18, %s506_s29 }
 0x2cf   :  { %v234_v30 = vpop.xlane.xlu0 %233 }
 0x2d0   :  { %365 = vrcp.f32 %v234_v30 }
 0x2d3   :  { %v257_v31 = vpop.permute.xlu0 %256 }
 0x2d4   :  { %259 = vst.msk [vmem:[#allocation11] sm:$0xf] %vm225_vm3, %v257_v31 }
 0x2d5   :  { %438 = shalt.err (!%p435_p5)
}
 0x2d6   :  { %299 = dma.vmem_to_hbm [thread:$0]  %s297_s10, 64, %s605_s9, [#allocation12]  }
 0x2d7   :  { %s508_s7 = smov [#allocation7]   ;;  %s509_s15 = smov [#allocation10]  }
 0x2d8   :  { %s266_s14 = sshll.u32 %s508_s7, 4  ;;  %s286_s16 = sshll.u32 %s509_s15, 4  ;;  %s267_s14 = int_to_ptr.vmem [resolvable:$true] %s266_s14  ;;  %s287_s16 = int_to_ptr.vmem [resolvable:$true] %s286_s16 }
 0x2d9   :  { %s447_s17 = scalar_lea.vmem %s267_s14, 64  ;;  %p452_p7 = scmp.lt.s32.totalorder %s267_s14, %s267_s14 }
 0x2da   :  { %p448_p6 = scmp.ne.s32.totalorder %s267_s14, %s447_s17  ;;  %p453_p8 = scmp.lt.s32.totalorder %s447_s17, %s447_s17 }
 0x2dc   :  { %p454_p9 = por %p453_p8, %p452_p7 }
 0x2dd   :  { %v366_v32 = vpop.eup %365 }
 0x2de   :  { %v236_v33 = vmul.f32 %v366_v32, %v364_v28  ;;  %p455_p10 = pnand %p454_p9, %p448_p6 }
 0x2e0   :  { %237 = vst.msk [vmem:[#allocation7] sm:$0xf] %vm225_vm3, %v236_v33  ;;  %v246_v34 = vmul.f32 %v244_v23, %v236_v33 }
 0x2e1   :  { %458 = shalt.err (!%p455_p10)
}
 0x2e2   :  { %269 = dma.vmem_to_hbm [thread:$0]  %s267_s14, 64, %s602_s6, [#allocation4]   ;;  %247 = vst.msk [vmem:[#allocation10] sm:$0xf] %vm225_vm3, %v246_v34 }
 0x2e3   :  { %s467_s19 = scalar_lea.vmem %s287_s16, 64  ;;  %p472_p12 = scmp.lt.s32.totalorder %s287_s16, %s287_s16 }
 0x2e4   :  { %p468_p11 = scmp.ne.s32.totalorder %s287_s16, %s467_s19  ;;  %p473_p13 = scmp.lt.s32.totalorder %s467_s19, %s467_s19 }
 0x2e6   :  { %p474_p0 = por %p473_p13, %p472_p12 }
 0x2e8   :  { %p475_p1 = pnand %p474_p0, %p468_p11 }
 0x2ea   :  { %478 = shalt.err (!%p475_p1)
}
 0x2eb   :  { %289 = dma.vmem_to_hbm [thread:$0]  %s287_s16, 64, %s604_s8, [#allocation9]  }
 0x2ec   :  { %491 = dma.done.wait [#allocation4], 64  }
 0x2ed   :  { %492 = vsyncadd [#allocation4], 4294967232 }
 0x2ee   :  { %493 = dma.done.wait [#allocation9], 128  }
 0x2ef   :  { %494 = vsyncadd [#allocation9], 4294967168 }
 0x2f0   :  { %495 = dma.done.wait [#allocation12], 64  }
 0x2f1   :  { %496 = vsyncadd [#allocation12], 4294967232 }
 0x2f2   :  { %312 = vsyncpa [#allocation3], 1 }
 0x2f3   :  { %313 = vsyncpa [#allocation6], 1 }
 0x2f4   :  { %314 = vsyncpa [#allocation4], 1 }
 0x2f5   :  { %315 = vsyncpa [#allocation9], 1 }
 0x2f6   :  { %316 = vsyncpa [#allocation12], 1 }

</bundles_post_ra>
